<compile_context>
chip_gen: v6e
topology: v6e:2x2x1
jax: 0.10.0
libtpu: 0.0.40
codegen_flags: <defaults>
</compile_context>

<pallas_src>
import jax
import jax.numpy as jnp
from jax import lax
from jax.experimental import pallas as pl
from jax.experimental.pallas import tpu as pltpu
from jax.scipy.linalg import block_diag


def _stl_kernel(x_ref, a_ref, vblk_ref, ones_ref, out_ref):
    """Fused multi-head attention readout for one block of query rows.

    x_ref    : [tm, d_q]        query rows (one row block)
    a_ref    : [d_q, H*T]       Wq @ blockdiag(scale * K_h^T)  (scores operator)
    vblk_ref : [H*T, U]         blockdiag(V_h)                  (readout operator)
    ones_ref : [H*T, U]         blockdiag(ones(T, hd))          (per-head denom)
    out_ref  : [tm, out_lanes]  lanes [0, U) hold the result, rest zero-padded
    """
    tm = x_ref.shape[0]
    num_units = vblk_ref.shape[1]

    # All-head scores side by side along lanes: ONE MXU push.
    s = jnp.dot(x_ref[...], a_ref[...], preferred_element_type=jnp.float32)  # [tm, H*T]

    # Row-global max: softmax is shift-invariant, so subtracting the same
    # constant from every head keeps the result exact while avoiding
    # lane-segment (per-head) reductions.
    s = s - jnp.max(s, axis=-1, keepdims=True)
    p = jnp.exp(s)

    # Un-normalized readout and per-head softmax denominators. The
    # block-diagonal right-hand sides already place head h at output lanes
    # [h*hd, (h+1)*hd), so no per-head slicing or concatenation is needed.
    num = jnp.dot(p, vblk_ref[...], preferred_element_type=jnp.float32)   # [tm, U]
    den = jnp.dot(p, ones_ref[...], preferred_element_type=jnp.float32)   # [tm, U]
    o = num / den                                                          # exact

    pad_lanes = out_ref.shape[1] - num_units
    if pad_lanes:  # pad to a lane-dense (128-multiple) slab -> unmasked stores
        o = jnp.concatenate([o, jnp.zeros((tm, pad_lanes), jnp.float32)], axis=-1)
    out_ref[...] = o.astype(out_ref.dtype)


def _round_up(x: int, m: int) -> int:
    return ((x + m - 1) // m) * m


def _pick_row_tile(n_pad: int) -> int:
    """Row tile: >= 2 balanced grid steps when possible (v7x megacore), cap 512."""
    if n_pad <= 8:
        return 8
    return min(512, _round_up(-(-n_pad // 2), 8))


def stl_forward(inputs, embed, wq, wk, wv, *, num_heads: int):
    """inputs: [N, d_q]; returns style embedding [N, 1, num_units]."""
    N, d_q = inputs.shape
    token_num, d_k = embed.shape
    num_units = wq.shape[1]
    head_dim = num_units // num_heads
    f32 = jnp.float32
    hi = lax.Precision.HIGHEST

    # ---- batch-invariant precompute (hoisted out of the kernel) -------------
    keys = jnp.tanh(embed.astype(f32))                                   # [T, d_k]
    k_proj = jnp.dot(keys, wk.astype(f32), precision=hi)                 # [T, U]
    v_proj = jnp.dot(keys, wv.astype(f32), precision=hi)                 # [T, U]
    scale = 1.0 / (float(d_k) ** 0.5)

    k_heads = [k_proj[:, h * head_dim:(h + 1) * head_dim].T * scale
               for h in range(num_heads)]                                # [hd, T] each
    v_heads = [v_proj[:, h * head_dim:(h + 1) * head_dim]
               for h in range(num_heads)]                                # [T, hd] each
    k_blockdiag = block_diag(*k_heads)                                   # [U, H*T]
    v_blockdiag = block_diag(*v_heads)                                   # [H*T, U]
    ones_map = block_diag(*([jnp.ones((token_num, head_dim), f32)] * num_heads))

    # Fold the query projection into the score operator: x @ (Wq @ Kblk).
    a_mat = jnp.dot(wq.astype(f32), k_blockdiag, precision=hi)           # [d_q, H*T]

    # ---- row tiling ----------------------------------------------------------
    n_pad = _round_up(max(N, 1), 8)          # sublane-align the row blocks
    tm = _pick_row_tile(n_pad)
    n_pad = _round_up(n_pad, tm)             # grid covers the array exactly
    grid = (n_pad // tm,)

    x = inputs.astype(f32)
    if n_pad != N:
        x = jnp.pad(x, ((0, n_pad - N), (0, 0)))   # zero rows -> finite softmax

    out_lanes = _round_up(num_units, 128)    # lane-dense (unmasked) stores

    out = pl.pallas_call(
        _stl_kernel,
        out_shape=jax.ShapeDtypeStruct((n_pad, out_lanes), f32),
        grid_spec=pltpu.PrefetchScalarGridSpec(
            num_scalar_prefetch=0,
            grid=grid,
            in_specs=[
                pl.BlockSpec((tm, d_q), lambda i: (i, 0)),
                pl.BlockSpec(a_mat.shape, lambda i: (0, 0)),
                pl.BlockSpec(v_blockdiag.shape, lambda i: (0, 0)),
                pl.BlockSpec(ones_map.shape, lambda i: (0, 0)),
            ],
            out_specs=pl.BlockSpec((tm, out_lanes), lambda i: (i, 0)),
        ),
        compiler_params=pltpu.CompilerParams(
            dimension_semantics=("parallel",)),
    )(x, a_mat, v_blockdiag, ones_map)

    return out[:N, :num_units][:, None, :]                              # [N, 1, U]


def _reference(inputs, embed, wq, wk, wv, *, num_heads: int):
    """Pure-JAX reference mirroring the PyTorch STL / MultiHeadAttention."""
    N = inputs.shape[0]
    num_units = wq.shape[1]
    head_dim = num_units // num_heads
    key_dim = embed.shape[1]

    query = inputs[:, None, :]                                           # [N, 1, d_q]
    keys = jnp.broadcast_to(jnp.tanh(embed)[None], (N,) + embed.shape)   # [N, T, d_k]

    querys = query @ wq                                                  # [N, 1, U]
    keys_p = keys @ wk                                                   # [N, T, U]
    values = keys @ wv                                                   # [N, T, U]

    def split_heads(t):  # [N, L, U] -> [h, N, L, hd]
        n, l, _ = t.shape
        return jnp.moveaxis(t.reshape(n, l, num_heads, head_dim), 2, 0)

    qh, kh, vh = split_heads(querys), split_heads(keys_p), split_heads(values)
    scores = (qh @ jnp.swapaxes(kh, 2, 3)) / (key_dim ** 0.5)            # [h, N, 1, T]
    scores = jax.nn.softmax(scores, axis=3)
    out = scores @ vh                                                    # [h, N, 1, hd]
    out = jnp.concatenate(jnp.split(out, num_heads, axis=0), axis=3)[0]  # [N, 1, U]
    return out


if __name__ == "__main__":
    # Small hyperparameters consistent with the module.
    token_num = 10
    token_embedding_size = 32          # num_units
    num_heads = 4
    ref_enc_gru_size = 16              # d_q
    N = 2

    d_q = ref_enc_gru_size
    d_k = token_embedding_size // num_heads
    num_units = token_embedding_size

    key = jax.random.PRNGKey(0)
    k_in, k_emb, k_q, k_k, k_v, k_big = jax.random.split(key, 6)

    inputs = jax.random.normal(k_in, (N, d_q), dtype=jnp.float32)
    embed = 0.5 * jax.random.normal(k_emb, (token_num, d_k), dtype=jnp.float32)
    wq = 0.1 * jax.random.normal(k_q, (d_q, num_units), dtype=jnp.float32)
    wk = 0.1 * jax.random.normal(k_k, (d_k, num_units), dtype=jnp.float32)
    wv = 0.1 * jax.random.normal(k_v, (d_k, num_units), dtype=jnp.float32)

    # Tolerance covers the (mathematically exact) reassociation of the folded
    # score operator and default-precision XLA matmuls in the reference.
    atol = rtol = 2e-3

    out = jax.block_until_ready(stl_forward(inputs, embed, wq, wk, wv,
                                            num_heads=num_heads))
    ref = _reference(inputs, embed, wq, wk, wv, num_heads=num_heads)
    assert out.shape == (N, 1, num_units), out.shape
    assert jnp.allclose(out, ref, atol=atol, rtol=rtol), "mismatch vs reference (N=2)"

    # Batched path: exercises the padded, row-tiled, 2-step parallel grid.
    N_big = 48
    inputs_big = jax.random.normal(k_big, (N_big, d_q), dtype=jnp.float32)
    out_big = jax.block_until_ready(stl_forward(inputs_big, embed, wq, wk, wv,
                                                num_heads=num_heads))
    ref_big = _reference(inputs_big, embed, wq, wk, wv, num_heads=num_heads)
    assert out_big.shape == (N_big, 1, num_units), out_big.shape
    assert jnp.allclose(out_big, ref_big, atol=atol, rtol=rtol), \
        "mismatch vs reference (batched)"

    print("KERNEL_OK")
</pallas_src>

<mosaic_0001>
module attributes {stable_mosaic.version = 11 : i64} {
  func.func @_stl_kernel(%arg0: i32, %arg1: memref<8x16xf32, #tpu.memory_space<vmem>>, %arg2: memref<16x40xf32, #tpu.memory_space<vmem>>, %arg3: memref<40x32xf32, #tpu.memory_space<vmem>>, %arg4: memref<40x32xf32, #tpu.memory_space<vmem>>, %arg5: memref<8x128xf32, #tpu.memory_space<vmem>>) attributes {dimension_semantics = [#tpu.dimension_semantics<parallel>], iteration_bounds = array<i64: 1>, scalar_prefetch = 0 : i64, scratch_operands = 0 : i64, tpu.core_type = #tpu.core_type<tc>, window_params = [{transform_indices = @transform_0, window_bounds = array<i64: 8, 16>}, {pipeline_mode = #tpu.pipeline_mode<synchronous>, transform_indices = @transform_1, window_bounds = array<i64: 16, 40>}, {pipeline_mode = #tpu.pipeline_mode<synchronous>, transform_indices = @transform_2, window_bounds = array<i64: 40, 32>}, {pipeline_mode = #tpu.pipeline_mode<synchronous>, transform_indices = @transform_3, window_bounds = array<i64: 40, 32>}, {transform_indices = @transform_4, window_bounds = array<i64: 8, 128>}]} {
    %c0 = arith.constant 0 : index
    %c0_0 = arith.constant 0 : index
    %0 = vector.load %arg1[%c0, %c0_0] : memref<8x16xf32, #tpu.memory_space<vmem>>, vector<8x16xf32>
    %c0_1 = arith.constant 0 : index
    %c0_2 = arith.constant 0 : index
    %1 = vector.load %arg2[%c0_1, %c0_2] : memref<16x40xf32, #tpu.memory_space<vmem>>, vector<16x40xf32>
    %cst = arith.constant dense<0.000000e+00> : vector<8x40xf32>
    %2 = tpu.matmul %0, %1, %cst {dimension_numbers = #tpu.dot_dimension_numbers<[1], [0], [0], [1], [0, 0, 1, 1], [], []>} : vector<8x16xf32>, vector<16x40xf32>, vector<8x40xf32> -> vector<8x40xf32>
    %cst_3 = arith.constant dense<0xFF800000> : vector<8xf32>
    %3 = vector.multi_reduction <maximumf>, %2, %cst_3 [1] : vector<8x40xf32> to vector<8xf32>
    %4 = vector.shape_cast %3 : vector<8xf32> to vector<8x1xf32>
    %5 = vector.broadcast %4 : vector<8x1xf32> to vector<8x40xf32>
    %6 = arith.subf %2, %5 : vector<8x40xf32>
    %7 = math.exp %6 : vector<8x40xf32>
    %c0_4 = arith.constant 0 : index
    %c0_5 = arith.constant 0 : index
    %8 = vector.load %arg3[%c0_4, %c0_5] : memref<40x32xf32, #tpu.memory_space<vmem>>, vector<40x32xf32>
    %cst_6 = arith.constant dense<0.000000e+00> : vector<8x32xf32>
    %9 = tpu.matmul %7, %8, %cst_6 {dimension_numbers = #tpu.dot_dimension_numbers<[1], [0], [0], [1], [0, 0, 1, 1], [], []>} : vector<8x40xf32>, vector<40x32xf32>, vector<8x32xf32> -> vector<8x32xf32>
    %c0_7 = arith.constant 0 : index
    %c0_8 = arith.constant 0 : index
    %10 = vector.load %arg4[%c0_7, %c0_8] : memref<40x32xf32, #tpu.memory_space<vmem>>, vector<40x32xf32>
    %cst_9 = arith.constant dense<0.000000e+00> : vector<8x32xf32>
    %11 = tpu.matmul %7, %10, %cst_9 {dimension_numbers = #tpu.dot_dimension_numbers<[1], [0], [0], [1], [0, 0, 1, 1], [], []>} : vector<8x40xf32>, vector<40x32xf32>, vector<8x32xf32> -> vector<8x32xf32>
    %12 = arith.divf %9, %11 : vector<8x32xf32>
    %cst_10 = arith.constant 0.000000e+00 : f32
    %13 = vector.broadcast %cst_10 : f32 to vector<8x96xf32>
    %14 = tpu.concatenate %12, %13 in 1 : vector<8x32xf32>, vector<8x96xf32> -> vector<8x128xf32>
    %c0_11 = arith.constant 0 : index
    %c0_12 = arith.constant 0 : index
    %15 = vector.load %arg5[%c0_11, %c0_12] : memref<8x128xf32, #tpu.memory_space<vmem>>, vector<8x128xf32>
    tpu.vector_store %arg5[%c0_11, %c0_12], %14 {strides = array<i32>} : memref<8x128xf32, #tpu.memory_space<vmem>>, vector<8x128xf32>,
    return
  }
  func.func @transform_0(%arg0: i32) -> (i32, i32) {
    %c0_i32 = arith.constant 0 : i32
    %c0_i32_0 = arith.constant 0 : i32
    return %arg0, %c0_i32 : i32, i32
  }
  func.func @transform_1(%arg0: i32) -> (i32, i32) {
    %c0_i32 = arith.constant 0 : i32
    %c0_i32_0 = arith.constant 0 : i32
    %c0_i32_1 = arith.constant 0 : i32
    return %c0_i32, %c0_i32_0 : i32, i32
  }
  func.func @transform_2(%arg0: i32) -> (i32, i32) {
    %c0_i32 = arith.constant 0 : i32
    %c0_i32_0 = arith.constant 0 : i32
    %c0_i32_1 = arith.constant 0 : i32
    return %c0_i32, %c0_i32_0 : i32, i32
  }
  func.func @transform_3(%arg0: i32) -> (i32, i32) {
    %c0_i32 = arith.constant 0 : i32
    %c0_i32_0 = arith.constant 0 : i32
    %c0_i32_1 = arith.constant 0 : i32
    return %c0_i32, %c0_i32_0 : i32, i32
  }
  func.func @transform_4(%arg0: i32) -> (i32, i32) {
    %c0_i32 = arith.constant 0 : i32
    %c0_i32_0 = arith.constant 0 : i32
    return %arg0, %c0_i32 : i32, i32
  }
}

</mosaic_0001>

<bundles_post_ra>
// kernel: tpu_custom_call.1
= control target key start
LH: loop header
LB: loop body
LE: loop exit
PB: predicated region body
PF: predicated region fallthrough
CT: control target
= control target key end

     0   :  { %v354_v1 = vmov 0.0   ;;  %vm355_vm0 = vmmov 0   ;;  %s427_s0 = inlined_call_operand.vmem [shape: f32[8,16], index: 0, kind: input, shape index: {}]   ;;  %s428_s1 = inlined_call_operand.vmem [shape: f32[16,40], index: 1, kind: input, shape index: {}]   ;;  %s429_s2 = inlined_call_operand.vmem [shape: f32[40,32], index: 2, kind: input, shape index: {}]   ;;  %s430_s3 = inlined_call_operand.vmem [shape: f32[40,32], index: 3, kind: input, shape index: {}]   ;;  %s431_s4 = inlined_call_operand.hbm [shape: f32[8,128], index: 4, kind: output, shape index: {}]  }
   0x1   :  { %v20_v0 = vld [vmem:[%s428_s1 + $0x8] sm:$0xff]  ;;  %292 = vmatprep.subr.mxu0 %v354_v1  ;;  %v19_v2 = vld [vmem:[%s428_s1] sm:$0xff]  ;;  %296 = vmatprep.mubr.msk.f32.mxu0 %vm355_vm0, %v354_v1 }
   0x2   :  { %9 = vsyncpa [#allocation3], 0  ;;  %293 = vmatpush3.msra.mxu0 %v20_v0  ;;  %v18_v3 = vld [vmem:[%s427_s0] sm:$0xff]  ;;  %vm21_vm1 = vcmask 130048   ;;  %299 = vmatprep.subr.mxu1 %v354_v1  ;;  %vm95_vm2 = vcmask 326656   ;;  %v105_v9 = vld [vmem:[%s429_s2 + $0x18] sm:$0xff] }
   0x3   :  { %294 = vmatprep.subr.mxu0 %v354_v1  ;;  %309 = vmatprep.mubr.msk.f32.mxu1 %vm355_vm0, %v354_v1  ;;  %v106_v7 = vld [vmem:[%s429_s2 + $0x20] sm:$0xff]  ;;  %v183_v10 = vld [vmem:[%s430_s3 + $0x18] sm:$0xff]  ;;  %v104_v11 = vld [vmem:[%s429_s2 + $0x10] sm:$0xff]  ;;  %vm257_vm3 = vcmask 261120  }
   0x4   :  { %295 = vmatpush3.msra.mxu0 %v19_v2  ;;  %v184_v8 = vld [vmem:[%s430_s3 + $0x20] sm:$0xff]  ;;  %300 = vmatpush3.msra.mxu1 %v106_v7  ;;  %v182_v12 = vld [vmem:[%s430_s3 + $0x10] sm:$0xff]  ;;  %v103_v13 = vld [vmem:[%s429_s2 + $0x8] sm:$0xff] }
   0x5   :  { %297 = vmatmul.mubr.msk.f32.vlgmr.msra.gmra.mxu0 %vm21_vm1, %v18_v3  ;;  %312 = vmatprep.subr.mxu0 %v354_v1  ;;  %v181_v14 = vld [vmem:[%s430_s3 + $0x8] sm:$0xff]  ;;  %v102_v15 = vld [vmem:[%s429_s2] sm:$0xff]  ;;  %s356_s2 = smov [#allocation2]  }
   0x6   :  { %322 = vmatprep.mubr.msk.f32.mxu0 %vm355_vm0, %v354_v1  ;;  %313 = vmatpush3.msra.mxu0 %v184_v8  ;;  %v180_v16 = vld [vmem:[%s430_s3] sm:$0xff]  ;;  %s266_s3 = sshll.u32 %s356_s2, 4  ;;  %s267_s3 = int_to_ptr.vmem [resolvable:$true] %s266_s3 }
   0x7   :  { %301 = vmatprep.subr.mxu1 %v354_v1  ;;  %314 = vmatprep.subr.mxu0 %v354_v1  ;;  %s332_s13 = scalar_lea.vmem %s267_s3, 128  ;;  %p337_p1 = scmp.lt.s32.totalorder %s267_s3, %s267_s3 }
   0x8   :  { %302 = vmatpush3.msra.mxu1 %v105_v9  ;;  %315 = vmatpush3.msra.mxu0 %v183_v10  ;;  %p333_p0 = scmp.ne.s32.totalorder %s267_s3, %s332_s13  ;;  %p338_p2 = scmp.lt.s32.totalorder %s332_s13, %s332_s13 }
   0x9   :  { %303 = vmatprep.subr.mxu1 %v354_v1  ;;  %316 = vmatprep.subr.mxu0 %v354_v1 }
   0xa   :  { %304 = vmatpush3.msra.mxu1 %v104_v11  ;;  %317 = vmatpush3.msra.mxu0 %v182_v12  ;;  %p339_p3 = por %p338_p2, %p337_p1 }
   0xb   :  { %305 = vmatprep.subr.mxu1 %v354_v1  ;;  %318 = vmatprep.subr.mxu0 %v354_v1 }
   0xc   :  { %306 = vmatpush3.msra.mxu1 %v103_v13  ;;  %319 = vmatpush3.msra.mxu0 %v181_v14  ;;  %p340_p4 = pnand %p339_p3, %p333_p0 }
   0xd   :  { %307 = vmatprep.subr.mxu1 %v354_v1  ;;  %320 = vmatprep.subr.mxu0 %v354_v1 }
   0xe   :  { %308 = vmatpush3.msra.mxu1 %v102_v15  ;;  %321 = vmatpush3.msra.mxu0 %v180_v16 }
  0xc5   :  { %v91_v4 = vpop.f32.mrf.mxu0 }
  0xc6   :  { %v96_v5 = vsel %vm95_vm2, %v91_v4, -inf }
  0xc7   :  { %v298_v6 = vpop.f32.mrf.mxu0  ;;  %97 = vmax.xlane.f32.xlu0 %v96_v5 }
 0x150   :  { %v98_v17 = vpop.xlane.xlu0 %97 }
 0x151   :  { %v99_v18 = vsub.f32 %v91_v4, %v98_v17 }
 0x153   :  { %v100_v19 = vmul.f32 1.442695, %v99_v18 }
 0x155   :  { %328 = vpow2.f32 %v100_v19 }
 0x162   :  { %v329_v20 = vpop.eup %328 }
 0x163   :  { %310 = vmatmul.mubr.msk.f32.vlgmr.msra.gmra.mxu1 %vm95_vm2, %v329_v20  ;;  %323 = vmatmul.mubr.msk.f32.vlgmr.msra.gmra.mxu0 %vm95_vm2, %v329_v20 }
 0x223   :  { %v176_v21 = vpop.f32.mrf.mxu1  ;;  %v251_v22 = vpop.f32.mrf.mxu0 }
 0x224   :  { %330 = vrcp.f32 %v251_v22 }
 0x225   :  { %v311_v23 = vpop.f32.mrf.mxu1  ;;  %v324_v24 = vpop.f32.mrf.mxu0 }
 0x231   :  { %v331_v25 = vpop.eup %330 }
 0x232   :  { %v256_v26 = vmul.f32 %v331_v25, %v176_v21 }
 0x234   :  { %v258_v27 = vsel %vm257_vm3, %v256_v26, 0.0 }
 0x235   :  { %259 = vst [vmem:[#allocation2] sm:$0xff] %v258_v27 }
 0x236   :  { %343 = shalt.err (!%p340_p4)
}
 0x237   :  { %269 = dma.vmem_to_hbm [thread:$0]  %s267_s3, 128, %s431_s4, [#allocation3]  }
 0x238   :  { %352 = dma.done.wait [#allocation3], 128  }
 0x239   :  { %353 = vsyncadd [#allocation3], 4294967168 }
 0x23a   :  { %273 = vsyncpa [#allocation3], 1 }

</bundles_post_ra>
